<compile_context>
chip_gen: v7x
topology: tpu7x:2x2x1
jax: 0.10.0
libtpu: 0.0.40
codegen_flags: <defaults>
</compile_context>

<pallas_src>
import functools

import jax
import jax.numpy as jnp
from jax.experimental import pallas as pl
from jax.experimental.pallas import tpu as pltpu

OUT_PAD = 128  # lane-dense padded output width (true logical width is 3)


def _mlp_kernel(x_ref, w1_ref, b1_ref, w2_ref, b2_ref, w3_ref, b3_ref, o_ref):
    x = x_ref[...]  # (TB, 2) f32

    # ---- Layer 1 on the VPU: K=2 contraction as two broadcast FMAs ----
    # x[:, 0:1] (TB,1) * w1[0:1,:] (1,16)  broadcasts to (TB,16)
    h1 = (x[:, 0:1] * w1_ref[0:1, :]
          + x[:, 1:2] * w1_ref[1:2, :]
          + b1_ref[...])                                  # (TB, 16)
    h1 = jnp.maximum(h1, 0.0)

    # ---- Layer 2 on the MXU (f32 accumulation) ----
    h2 = jnp.dot(h1, w2_ref[...],
                 preferred_element_type=jnp.float32) + b2_ref[...]   # (TB, 16)
    h2 = jnp.maximum(h2, 0.0)

    # ---- Layer 3 on the MXU, written lane-dense (padded to 128 features) ----
    out = jnp.dot(h2, w3_ref[...],
                  preferred_element_type=jnp.float32) + b3_ref[...]  # (TB, 128)
    o_ref[...] = out.astype(o_ref.dtype)


def _round_up(n, m):
    return ((n + m - 1) // m) * m


@functools.partial(jax.jit, static_argnames=("block_b",))
def risk_classifier_forward(x, params, *, block_b=2048):
    """x: (B, 2) float32. params: dict of w1,b1,w2,b2,w3,b3 (pre-transposed)."""
    B = x.shape[0]

    # Batch tile: multiple of 8 sublanes, capped at block_b (~2048 rows is well
    # inside the VMEM scoped default even with double-buffering on all chips).
    TB = min(block_b, _round_up(B, 8))
    B_pad = _round_up(B, TB)
    if B_pad != B:
        x = jnp.pad(x, ((0, B_pad - B), (0, 0)))

    # Zero-pad layer-3 params to a lane-dense 128-wide output slab.
    w3p = jnp.pad(params["w3"], ((0, 0), (0, OUT_PAD - params["w3"].shape[1])))
    b3p = jnp.pad(params["b3"], ((0, 0), (0, OUT_PAD - params["b3"].shape[1])))

    grid = (B_pad // TB,)

    # Resident (constant-index) specs for the small weight/bias tensors.
    def resident(shape):
        return pl.BlockSpec(shape, lambda i: (0, 0))

    param_bytes = sum(int(p.size) * 4 for p in
                      (params["w1"], params["b1"], params["w2"], params["b2"],
                       w3p, b3p))
    cost = pl.CostEstimate(
        flops=int(B_pad) * (2 * 2 * 16 + 2 * 16 * 16 + 2 * 16 * OUT_PAD),
        transcendentals=0,
        bytes_accessed=int(B_pad) * (2 + OUT_PAD) * 4 + param_bytes,
    )

    out_padded = pl.pallas_call(
        _mlp_kernel,
        out_shape=jax.ShapeDtypeStruct((B_pad, OUT_PAD), jnp.float32),
        grid=grid,
        in_specs=[
            pl.BlockSpec((TB, 2), lambda i: (i, 0)),      # x: tiled over batch
            resident(params["w1"].shape),                 # (2, 16)
            resident(params["b1"].shape),                 # (1, 16)
            resident(params["w2"].shape),                 # (16, 16)
            resident(params["b2"].shape),                 # (1, 16)
            resident(w3p.shape),                          # (16, 128)
            resident(b3p.shape),                          # (1, 128)
        ],
        out_specs=pl.BlockSpec((TB, OUT_PAD), lambda i: (i, 0)),
        compiler_params=pltpu.CompilerParams(
            dimension_semantics=("parallel",)),
        cost_estimate=cost,
    )(x,
      params["w1"], params["b1"],
      params["w2"], params["b2"],
      w3p, b3p)

    # Drop batch padding and the lane padding (only first 3 features are real).
    return out_padded[:B, :3]


def init_params(key):
    """Deterministic init mimicking nn.Linear's U(-1/sqrt(fan_in), 1/sqrt(fan_in)).

    Weights stored as (in_features, out_features); biases as (1, out_features).
    """
    def linear(k, fan_in, fan_out):
        kw, kb = jax.random.split(k)
        bound = 1.0 / jnp.sqrt(fan_in)
        w = jax.random.uniform(kw, (fan_in, fan_out), jnp.float32, -bound, bound)
        b = jax.random.uniform(kb, (1, fan_out), jnp.float32, -bound, bound)
        return w, b

    k1, k2, k3 = jax.random.split(key, 3)
    w1, b1 = linear(k1, 2, 16)
    w2, b2 = linear(k2, 16, 16)
    w3, b3 = linear(k3, 16, 3)
    return {"w1": w1, "b1": b1, "w2": w2, "b2": b2, "w3": w3, "b3": b3}


def _reference_forward(x, p):
    h1 = jnp.maximum(x @ p["w1"] + p["b1"], 0.0)
    h2 = jnp.maximum(h1 @ p["w2"] + p["b2"], 0.0)
    return h2 @ p["w3"] + p["b3"]


if __name__ == "__main__":
    key = jax.random.PRNGKey(0)
    kx, kx2, kp = jax.random.split(key, 3)

    params = init_params(kp)

    # Small batch (grid of 1 tile).
    B = 8
    x = jax.random.normal(kx, (B, 2), dtype=jnp.float32)
    out = jax.block_until_ready(risk_classifier_forward(x, params))
    ref = _reference_forward(x, params)
    assert out.shape == (B, 3)
    assert jnp.allclose(out, ref, atol=1e-5, rtol=1e-5)

    # Batch that is not a multiple of the tile (exercises batch padding path).
    B2 = 300
    x2 = jax.random.normal(kx2, (B2, 2), dtype=jnp.float32)
    out2 = jax.block_until_ready(risk_classifier_forward(x2, params))
    ref2 = _reference_forward(x2, params)
    assert out2.shape == (B2, 3)
    assert jnp.allclose(out2, ref2, atol=1e-5, rtol=1e-5)

    print("KERNEL_OK")
</pallas_src>

<mosaic_0001>
module attributes {stable_mosaic.version = 11 : i64} {
  func.func @_mlp_kernel(%arg0: i32, %arg1: memref<8x2xf32, #tpu.memory_space<vmem>>, %arg2: memref<2x16xf32, #tpu.memory_space<vmem>>, %arg3: memref<1x16xf32, #tpu.memory_space<vmem>>, %arg4: memref<16x16xf32, #tpu.memory_space<vmem>>, %arg5: memref<1x16xf32, #tpu.memory_space<vmem>>, %arg6: memref<16x128xf32, #tpu.memory_space<vmem>>, %arg7: memref<1x128xf32, #tpu.memory_space<vmem>>, %arg8: memref<8x128xf32, #tpu.memory_space<vmem>>) attributes {dimension_semantics = [#tpu.dimension_semantics<parallel>], iteration_bounds = array<i64: 1>, scalar_prefetch = 0 : i64, scratch_operands = 0 : i64, tpu.core_type = #tpu.core_type<tc>, window_params = [{transform_indices = @transform_0, window_bounds = array<i64: 8, 2>}, {pipeline_mode = #tpu.pipeline_mode<synchronous>, transform_indices = @transform_1, window_bounds = array<i64: 2, 16>}, {pipeline_mode = #tpu.pipeline_mode<synchronous>, transform_indices = @transform_2, window_bounds = array<i64: 1, 16>}, {pipeline_mode = #tpu.pipeline_mode<synchronous>, transform_indices = @transform_3, window_bounds = array<i64: 16, 16>}, {pipeline_mode = #tpu.pipeline_mode<synchronous>, transform_indices = @transform_4, window_bounds = array<i64: 1, 16>}, {pipeline_mode = #tpu.pipeline_mode<synchronous>, transform_indices = @transform_5, window_bounds = array<i64: 16, 128>}, {pipeline_mode = #tpu.pipeline_mode<synchronous>, transform_indices = @transform_6, window_bounds = array<i64: 1, 128>}, {transform_indices = @transform_7, window_bounds = array<i64: 8, 128>}]} {
    %c0 = arith.constant 0 : index
    %c0_0 = arith.constant 0 : index
    %0 = vector.load %arg1[%c0, %c0_0] : memref<8x2xf32, #tpu.memory_space<vmem>>, vector<8x2xf32>
    %1 = vector.extract_strided_slice %0 {offsets = [0, 0], sizes = [8, 1], strides = [1, 1]} : vector<8x2xf32> to vector<8x1xf32>
    %c0_1 = arith.constant 0 : index
    %c0_2 = arith.constant 0 : index
    %2 = vector.load %arg2[%c0_1, %c0_2] : memref<2x16xf32, #tpu.memory_space<vmem>>, vector<1x16xf32>
    %3 = vector.broadcast %1 : vector<8x1xf32> to vector<8x16xf32>
    %4 = vector.broadcast %2 : vector<1x16xf32> to vector<8x16xf32>
    %5 = arith.mulf %3, %4 : vector<8x16xf32>
    %6 = vector.extract_strided_slice %0 {offsets = [0, 1], sizes = [8, 1], strides = [1, 1]} : vector<8x2xf32> to vector<8x1xf32>
    %c1 = arith.constant 1 : index
    %c0_3 = arith.constant 0 : index
    %7 = vector.load %arg2[%c1, %c0_3] : memref<2x16xf32, #tpu.memory_space<vmem>>, vector<1x16xf32>
    %8 = vector.broadcast %6 : vector<8x1xf32> to vector<8x16xf32>
    %9 = vector.broadcast %7 : vector<1x16xf32> to vector<8x16xf32>
    %10 = arith.mulf %8, %9 : vector<8x16xf32>
    %11 = arith.addf %5, %10 : vector<8x16xf32>
    %c0_4 = arith.constant 0 : index
    %c0_5 = arith.constant 0 : index
    %12 = vector.load %arg3[%c0_4, %c0_5] : memref<1x16xf32, #tpu.memory_space<vmem>>, vector<1x16xf32>
    %13 = vector.broadcast %12 : vector<1x16xf32> to vector<8x16xf32>
    %14 = arith.addf %11, %13 : vector<8x16xf32>
    %cst = arith.constant 0.000000e+00 : f32
    %15 = vector.broadcast %cst : f32 to vector<8x16xf32>
    %16 = arith.maximumf %14, %15 : vector<8x16xf32>
    %c0_6 = arith.constant 0 : index
    %c0_7 = arith.constant 0 : index
    %17 = vector.load %arg4[%c0_6, %c0_7] : memref<16x16xf32, #tpu.memory_space<vmem>>, vector<16x16xf32>
    %cst_8 = arith.constant dense<0.000000e+00> : vector<8x16xf32>
    %18 = tpu.matmul %16, %17, %cst_8 {dimension_numbers = #tpu.dot_dimension_numbers<[1], [0], [0], [1], [0, 0, 1, 1], [], []>} : vector<8x16xf32>, vector<16x16xf32>, vector<8x16xf32> -> vector<8x16xf32>
    %c0_9 = arith.constant 0 : index
    %c0_10 = arith.constant 0 : index
    %19 = vector.load %arg5[%c0_9, %c0_10] : memref<1x16xf32, #tpu.memory_space<vmem>>, vector<1x16xf32>
    %20 = vector.broadcast %19 : vector<1x16xf32> to vector<8x16xf32>
    %21 = arith.addf %18, %20 : vector<8x16xf32>
    %cst_11 = arith.constant 0.000000e+00 : f32
    %22 = vector.broadcast %cst_11 : f32 to vector<8x16xf32>
    %23 = arith.maximumf %21, %22 : vector<8x16xf32>
    %c0_12 = arith.constant 0 : index
    %c0_13 = arith.constant 0 : index
    %24 = vector.load %arg6[%c0_12, %c0_13] : memref<16x128xf32, #tpu.memory_space<vmem>>, vector<16x128xf32>
    %cst_14 = arith.constant dense<0.000000e+00> : vector<8x128xf32>
    %25 = tpu.matmul %23, %24, %cst_14 {dimension_numbers = #tpu.dot_dimension_numbers<[1], [0], [0], [1], [0, 0, 1, 1], [], []>} : vector<8x16xf32>, vector<16x128xf32>, vector<8x128xf32> -> vector<8x128xf32>
    %c0_15 = arith.constant 0 : index
    %c0_16 = arith.constant 0 : index
    %26 = vector.load %arg7[%c0_15, %c0_16] : memref<1x128xf32, #tpu.memory_space<vmem>>, vector<1x128xf32>
    %27 = vector.broadcast %26 : vector<1x128xf32> to vector<8x128xf32>
    %28 = arith.addf %25, %27 : vector<8x128xf32>
    %c0_17 = arith.constant 0 : index
    %c0_18 = arith.constant 0 : index
    %29 = vector.load %arg8[%c0_17, %c0_18] : memref<8x128xf32, #tpu.memory_space<vmem>>, vector<8x128xf32>
    tpu.vector_store %arg8[%c0_17, %c0_18], %28 {strides = array<i32>} : memref<8x128xf32, #tpu.memory_space<vmem>>, vector<8x128xf32>,
    return
  }
  func.func @transform_0(%arg0: i32) -> (i32, i32) {
    %c0_i32 = arith.constant 0 : i32
    %c0_i32_0 = arith.constant 0 : i32
    return %arg0, %c0_i32 : i32, i32
  }
  func.func @transform_1(%arg0: i32) -> (i32, i32) {
    %c0_i32 = arith.constant 0 : i32
    %c0_i32_0 = arith.constant 0 : i32
    %c0_i32_1 = arith.constant 0 : i32
    return %c0_i32, %c0_i32_0 : i32, i32
  }
  func.func @transform_2(%arg0: i32) -> (i32, i32) {
    %c0_i32 = arith.constant 0 : i32
    %c0_i32_0 = arith.constant 0 : i32
    %c0_i32_1 = arith.constant 0 : i32
    return %c0_i32, %c0_i32_0 : i32, i32
  }
  func.func @transform_3(%arg0: i32) -> (i32, i32) {
    %c0_i32 = arith.constant 0 : i32
    %c0_i32_0 = arith.constant 0 : i32
    %c0_i32_1 = arith.constant 0 : i32
    return %c0_i32, %c0_i32_0 : i32, i32
  }
  func.func @transform_4(%arg0: i32) -> (i32, i32) {
    %c0_i32 = arith.constant 0 : i32
    %c0_i32_0 = arith.constant 0 : i32
    %c0_i32_1 = arith.constant 0 : i32
    return %c0_i32, %c0_i32_0 : i32, i32
  }
  func.func @transform_5(%arg0: i32) -> (i32, i32) {
    %c0_i32 = arith.constant 0 : i32
    %c0_i32_0 = arith.constant 0 : i32
    %c0_i32_1 = arith.constant 0 : i32
    return %c0_i32, %c0_i32_0 : i32, i32
  }
  func.func @transform_6(%arg0: i32) -> (i32, i32) {
    %c0_i32 = arith.constant 0 : i32
    %c0_i32_0 = arith.constant 0 : i32
    %c0_i32_1 = arith.constant 0 : i32
    return %c0_i32, %c0_i32_0 : i32, i32
  }
  func.func @transform_7(%arg0: i32) -> (i32, i32) {
    %c0_i32 = arith.constant 0 : i32
    %c0_i32_0 = arith.constant 0 : i32
    return %arg0, %c0_i32 : i32, i32
  }
}

</mosaic_0001>

<bundles_post_ra>
// kernel: risk_classifier_forward.1
= control target key start
LH: loop header
LB: loop body
LE: loop exit
PB: predicated region body
PF: predicated region fallthrough
CT: control target
= control target key end

     0   :  { %v269_v0 = vmov 0   ;;  %v270_v2 = vmov 1   ;;  %v271_v6 = vmov 0.0|0.0   ;;  %vm272_vm0 = vmmov 0   ;;  %s347_s0 = inlined_call_operand.vmem [shape: f32[8,2], index: 0, kind: input, shape index: {}]   ;;  %s348_s3 = inlined_call_operand.vmem [shape: f32[16,16], index: 3, kind: input, shape index: {}]   ;;  %s349_s1 = inlined_call_operand.vmem [shape: f32[2,16], index: 1, kind: input, shape index: {}]   ;;  %s350_s2 = inlined_call_operand.vmem [shape: f32[1,16], index: 2, kind: input, shape index: {}]   ;;  %s351_s5 = inlined_call_operand.vmem [shape: f32[16,128], index: 5, kind: input, shape index: {}]   ;;  %s352_s4 = inlined_call_operand.vmem [shape: f32[1,16], index: 4, kind: input, shape index: {}]   ;;  %s353_s6 = inlined_call_operand.vmem [shape: f32[1,128], index: 6, kind: input, shape index: {}]   ;;  %s354_s7 = inlined_call_operand.vmem [shape: f32[8,128], index: 7, kind: output, shape index: {}]  }
   0x1   :  { %267 = vset.pattern.permute.xlu0 %v269_v0  ;;  %v26_v1 = vld [vmem:[%s347_s0] sm:$0xff]  ;;  %v59_v4 = vld [vmem:[%s348_s3 + $0x8] sm:$0xff]  ;;  %256 = vmatprep.subr.bf16.mxu0 %v271_v6  ;;  %v273_v7 = vmov 0.0   ;;  %vm67_vm1 = vcmask 130048  }
   0x2   :  { %30 = vperm.xlu0 %267, %v26_v1   ;;  %v58_v3 = vld [vmem:[%s348_s3] sm:$0xff]  ;;  %259 = vmatprep.subr.bf16.mxu1 %v271_v6  ;;  %v143_v19 = vld [vmem:[%s351_s5 + $0x8] sm:$0xff] }
   0x3   :  { %v257_v5 = vpack.c.bf16 %v59_v4, %v58_v3  ;;  %246 = vmatprep.mubr.msk.f32.mxu0 %vm272_vm0, %v273_v7  ;;  %253 = vmatprep.mubr.msk.f32.mxu1 %vm272_vm0, %v273_v7  ;;  %v229_v9 = vld [vmem:[%s349_s1] ss:$0 sm:$0xff]  ;;  %v230_v10 = vld [vmem:[%s349_s1 + $0x1] ss:$0 sm:$0xff] }
   0x4   :  { %v231_v14 = vld [vmem:[%s350_s2] ss:$0 sm:$0xff] }
   0x5   :  { %258 = vmatpush3.bf16.msra.mxu0 %v257_v5  ;;  %v142_v18 = vld [vmem:[%s351_s5] sm:$0xff] }
   0x6   :  { %268 = vset.pattern.permute.xlu0 %v270_v2  ;;  %v260_v20 = vpack.c.bf16 %v143_v19, %v142_v18  ;;  %v232_v21 = vld [vmem:[%s352_s4] ss:$0 sm:$0xff] }
   0x7   :  { %40 = vperm.xlu0 %268, %v26_v1   ;;  %v234_v26 = vld [vmem:[%s353_s6] ss:$0 sm:$0xff] }
   0x8   :  { %261 = vmatpush3.bf16.msra.mxu1 %v260_v20 }
  0x81   :  { %v31_v8 = vpop.permute.xlu0 %30 }
  0x82   :  { %v37_v12 = vmul.f32 %v229_v9, %v31_v8 }
  0x86   :  { %v41_v11 = vpop.permute.xlu0 %40 }
  0x87   :  { %v47_v13 = vmul.f32 %v230_v10, %v41_v11 }
  0x89   :  { %v48_v15 = vadd.f32 %v47_v13, %v37_v12 }
  0x8b   :  { %v56_v16 = vadd.f32 %v231_v14, %v48_v15 }
  0x8d   :  { %v57_v17 = vmax.f32 %v56_v16, 0.0 }
  0x8f   :  { %247 = vmatmul.mubr.msk.f32.vlgmr.msra.gmra.mrb[0].mxu0 %vm67_vm1, %v57_v17 }
 0x162   :  { %v137_v22 = vpop.f32.mrb[0].mxu0 }
 0x163   :  { %v138_v23 = vadd.f32 %v232_v21, %v137_v22  ;;  %v248_v24 = vpop.f32.mrb[1].mxu0 }
 0x165   :  { %v141_v25 = vmax.f32 %v138_v23, 0.0 }
 0x167   :  { %254 = vmatmul.mubr.msk.f32.vlgmr.msra.gmra.mrb[0].mxu1 %vm67_vm1, %v141_v25 }
 0x23a   :  { %v220_v27 = vpop.f32.mrb[0].mxu1 }
 0x23b   :  { %v221_v28 = vadd.f32 %v234_v26, %v220_v27  ;;  %v255_v29 = vpop.f32.mrb[1].mxu1 }
 0x23d   :  { %224 = vst [vmem:[%s354_s7] sm:$0xff] %v221_v28 }

</bundles_post_ra>
